<compile_context>
chip_gen: v7x
topology: tpu7x:2x2x1
jax: 0.10.0
libtpu: 0.0.40
codegen_flags: <defaults>
</compile_context>

<pallas_src>
import jax
import jax.numpy as jnp
from jax.experimental import pallas as pl
from jax.experimental.pallas import tpu as pltpu

MARGIN = 10.0
EPS = 1e-6


def _triplet_kernel(perm_ref, mask_ref, motion_ref, text_ref, text_hbm_ref,
                    out_ref, gathered_ref, dma_sems):
    """perm: SMEM (B,) i32.   mask: VMEM (B,1) i32.   motion/text: VMEM (B,D) f32.
    text_hbm: pl.ANY (HBM) (B,D) f32 gather source.   out: SMEM (1,) f32.
    gathered: VMEM (B,D) f32 scratch.   dma_sems: DMA semaphores (B,)."""
    B, D = motion_ref.shape

    # ---- In-kernel permutation gather (no HBM text_perm materialization) ----
    # One small row DMA per permuted row, all issued back-to-back (overlapped),
    # then waited.  B is a static Python int -> fully unrolled.
    copies = []
    for i in range(B):
        idx = perm_ref[i]                                  # SMEM scalar read
        cp = pltpu.make_async_copy(text_hbm_ref.at[pl.ds(idx, 1), :],
                                   gathered_ref.at[pl.ds(i, 1), :],
                                   dma_sems.at[i])
        cp.start()
        copies.append(cp)
    for cp in copies:
        cp.wait()

    a = motion_ref[...]             # anchor       (B, D)
    p = text_ref[...]               # positive     (B, D)
    pp = gathered_ref[...]          # text[perm]   (B, D)
    mask = mask_ref[...] != 0       # same-id rows (B, 1)

    eps = jnp.float32(EPS)
    # Negative slab never formed: when mask is true the negative is the anchor
    # itself, so (a - n + eps) == eps elementwise (matches torch pairwise_distance).
    diff_an = jnp.where(mask, eps, a - pp + eps)                           # (B, D)
    d_ap = jnp.sqrt(jnp.sum((a - p + eps) ** 2, axis=-1, keepdims=True))   # (B, 1)
    d_an = jnp.sqrt(jnp.sum(diff_an * diff_an, axis=-1, keepdims=True))    # (B, 1)
    hinge = jnp.maximum(d_ap - d_an + jnp.float32(MARGIN), jnp.float32(0.0))
    out_ref[0] = jnp.sum(hinge) / jnp.float32(B)


def contrastive_loss_pallas(text_features, motion_features, ids_int, perm):
    B, D = text_features.shape
    perm = perm.astype(jnp.int32)
    # Keep all in-kernel arithmetic f32 (v5e VPU/EUP have no bf16 path).
    text_features = text_features.astype(jnp.float32)
    motion_features = motion_features.astype(jnp.float32)

    # Same-id mask precomputed in the wrapper (tiny (B,) int compare): one (B,1)
    # i32 input instead of two id refs.
    mask_col = (ids_int == jnp.take(ids_int, perm)).astype(jnp.int32).reshape(B, 1)

    kernel = pl.pallas_call(
        _triplet_kernel,
        out_shape=jax.ShapeDtypeStruct((1,), jnp.float32),
        in_specs=[
            pl.BlockSpec(memory_space=pltpu.SMEM),   # perm          (B,)  i32
            pl.BlockSpec(memory_space=pltpu.VMEM),   # same-id mask  (B,1) i32
            pl.BlockSpec(memory_space=pltpu.VMEM),   # motion        (B,D) f32
            pl.BlockSpec(memory_space=pltpu.VMEM),   # text (positive slab)
            pl.BlockSpec(memory_space=pl.ANY),       # text slab in HBM (gather src)
        ],
        out_specs=pl.BlockSpec(memory_space=pltpu.SMEM),
        scratch_shapes=[
            pltpu.VMEM((B, D), jnp.float32),         # gathered text[perm]
            pltpu.SemaphoreType.DMA((B,)),           # one sem per row DMA
        ],
    )
    return kernel(perm, mask_col, motion_features, text_features, text_features)[0]


def contrastive_loss_ref(text_features, motion_features, ids_int, perm):
    """Pure-JAX reference mirroring the PyTorch forward."""
    mask = (ids_int == ids_int[perm])[:, None]
    neg = jnp.where(mask, motion_features, text_features[perm])
    d_ap = jnp.sqrt(jnp.sum((motion_features - text_features + EPS) ** 2, axis=-1))
    d_an = jnp.sqrt(jnp.sum((motion_features - neg + EPS) ** 2, axis=-1))
    return jnp.mean(jnp.maximum(d_ap - d_an + MARGIN, 0.0))


if __name__ == "__main__":
    B, D = 8, 32  # batch=8, hidden=32

    key = jax.random.PRNGKey(0)
    k_text, k_motion, k_perm = jax.random.split(key, 3)

    text_features = jax.random.normal(k_text, (B, D), dtype=jnp.float32)
    motion_features = jax.random.normal(k_motion, (B, D), dtype=jnp.float32)

    # feature_ids: string labels -> int labels (host-side glue, as in the module;
    # only the equality pattern matters so any consistent labelling is equivalent).
    feature_ids = ["a", "b", "a", "c", "b", "d", "c", "a"]
    id_to_int = {}
    for fid in feature_ids:
        if fid not in id_to_int:
            id_to_int[fid] = len(id_to_int)
    ids_int = jnp.asarray([id_to_int[f] for f in feature_ids], dtype=jnp.int32)

    # torch.randperm equivalent, made deterministic with a PRNGKey(0)-derived key.
    # TODO(synk): draw a fresh permutation per training step if per-call randomness is desired.
    perm = jax.random.permutation(k_perm, B).astype(jnp.int32)

    loss = contrastive_loss_pallas(text_features, motion_features, ids_int, perm)
    jax.block_until_ready(loss)

    loss_ref = contrastive_loss_ref(text_features, motion_features, ids_int, perm)
    assert jnp.allclose(loss, loss_ref, atol=1e-5, rtol=1e-5), (loss, loss_ref)

    print("KERNEL_OK")
</pallas_src>

<mosaic_0001>
module attributes {stable_mosaic.version = 11 : i64} {
  func.func @_triplet_kernel(%arg0: memref<8xi32, #tpu.memory_space<smem>>, %arg1: memref<8x1xi32, #tpu.memory_space<vmem>>, %arg2: memref<8x32xf32, #tpu.memory_space<vmem>>, %arg3: memref<8x32xf32, #tpu.memory_space<vmem>>, %arg4: memref<8x32xf32, #tpu.memory_space<any>>, %arg5: memref<1xf32, #tpu.memory_space<smem>>, %arg6: memref<8x32xf32, #tpu.memory_space<vmem>>, %arg7: memref<8x!tpu.dma_semaphore, #tpu.memory_space<semaphore_mem>>) attributes {dimension_semantics = [], scalar_prefetch = 0 : i64, scratch_operands = 2 : i64, tpu.core_type = #tpu.core_type<tc>} {
    %c0 = arith.constant 0 : index
    %0 = memref.load %arg0[%c0] : memref<8xi32, #tpu.memory_space<smem>>
    %c0_i32 = arith.constant 0 : i32
    %c0_i32_0 = arith.constant 0 : i32
    %1 = tpu.memref_slice %arg4[%0, %c0_i32_0] : memref<8x32xf32, #tpu.memory_space<any>> -> memref<1x32xf32, #tpu.memory_space<any>>
    %c0_i32_1 = arith.constant 0 : i32
    %c0_i32_2 = arith.constant 0 : i32
    %2 = tpu.memref_slice %arg6[%c0_i32_1, %c0_i32_2] : memref<8x32xf32, #tpu.memory_space<vmem>> -> memref<1x32xf32, #tpu.memory_space<vmem>>
    %3 = tpu.memref_slice %arg7[%c0_i32] : memref<8x!tpu.dma_semaphore, #tpu.memory_space<semaphore_mem>> -> memref<1x!tpu.dma_semaphore, #tpu.memory_space<semaphore_mem>>
    %4 = tpu.memref_squeeze %3 : memref<1x!tpu.dma_semaphore, #tpu.memory_space<semaphore_mem>> -> memref<!tpu.dma_semaphore, #tpu.memory_space<semaphore_mem>>
    tpu.enqueue_dma source(%1 : memref<1x32xf32, #tpu.memory_space<any>>) target(%2 : memref<1x32xf32, #tpu.memory_space<vmem>>) target_semaphore(%4 : memref<!tpu.dma_semaphore, #tpu.memory_space<semaphore_mem>>)
    %c1 = arith.constant 1 : index
    %5 = memref.load %arg0[%c1] : memref<8xi32, #tpu.memory_space<smem>>
    %c1_i32 = arith.constant 1 : i32
    %c0_i32_3 = arith.constant 0 : i32
    %6 = tpu.memref_slice %arg4[%5, %c0_i32_3] : memref<8x32xf32, #tpu.memory_space<any>> -> memref<1x32xf32, #tpu.memory_space<any>>
    %c1_i32_4 = arith.constant 1 : i32
    %c0_i32_5 = arith.constant 0 : i32
    %7 = tpu.memref_slice %arg6[%c1_i32_4, %c0_i32_5] : memref<8x32xf32, #tpu.memory_space<vmem>> -> memref<1x32xf32, #tpu.memory_space<vmem>>
    %8 = tpu.memref_slice %arg7[%c1_i32] : memref<8x!tpu.dma_semaphore, #tpu.memory_space<semaphore_mem>> -> memref<1x!tpu.dma_semaphore, #tpu.memory_space<semaphore_mem>>
    %9 = tpu.memref_squeeze %8 : memref<1x!tpu.dma_semaphore, #tpu.memory_space<semaphore_mem>> -> memref<!tpu.dma_semaphore, #tpu.memory_space<semaphore_mem>>
    tpu.enqueue_dma source(%6 : memref<1x32xf32, #tpu.memory_space<any>>) target(%7 : memref<1x32xf32, #tpu.memory_space<vmem>>) target_semaphore(%9 : memref<!tpu.dma_semaphore, #tpu.memory_space<semaphore_mem>>)
    %c2 = arith.constant 2 : index
    %10 = memref.load %arg0[%c2] : memref<8xi32, #tpu.memory_space<smem>>
    %c2_i32 = arith.constant 2 : i32
    %c0_i32_6 = arith.constant 0 : i32
    %11 = tpu.memref_slice %arg4[%10, %c0_i32_6] : memref<8x32xf32, #tpu.memory_space<any>> -> memref<1x32xf32, #tpu.memory_space<any>>
    %c2_i32_7 = arith.constant 2 : i32
    %c0_i32_8 = arith.constant 0 : i32
    %12 = tpu.memref_slice %arg6[%c2_i32_7, %c0_i32_8] : memref<8x32xf32, #tpu.memory_space<vmem>> -> memref<1x32xf32, #tpu.memory_space<vmem>>
    %13 = tpu.memref_slice %arg7[%c2_i32] : memref<8x!tpu.dma_semaphore, #tpu.memory_space<semaphore_mem>> -> memref<1x!tpu.dma_semaphore, #tpu.memory_space<semaphore_mem>>
    %14 = tpu.memref_squeeze %13 : memref<1x!tpu.dma_semaphore, #tpu.memory_space<semaphore_mem>> -> memref<!tpu.dma_semaphore, #tpu.memory_space<semaphore_mem>>
    tpu.enqueue_dma source(%11 : memref<1x32xf32, #tpu.memory_space<any>>) target(%12 : memref<1x32xf32, #tpu.memory_space<vmem>>) target_semaphore(%14 : memref<!tpu.dma_semaphore, #tpu.memory_space<semaphore_mem>>)
    %c3 = arith.constant 3 : index
    %15 = memref.load %arg0[%c3] : memref<8xi32, #tpu.memory_space<smem>>
    %c3_i32 = arith.constant 3 : i32
    %c0_i32_9 = arith.constant 0 : i32
    %16 = tpu.memref_slice %arg4[%15, %c0_i32_9] : memref<8x32xf32, #tpu.memory_space<any>> -> memref<1x32xf32, #tpu.memory_space<any>>
    %c3_i32_10 = arith.constant 3 : i32
    %c0_i32_11 = arith.constant 0 : i32
    %17 = tpu.memref_slice %arg6[%c3_i32_10, %c0_i32_11] : memref<8x32xf32, #tpu.memory_space<vmem>> -> memref<1x32xf32, #tpu.memory_space<vmem>>
    %18 = tpu.memref_slice %arg7[%c3_i32] : memref<8x!tpu.dma_semaphore, #tpu.memory_space<semaphore_mem>> -> memref<1x!tpu.dma_semaphore, #tpu.memory_space<semaphore_mem>>
    %19 = tpu.memref_squeeze %18 : memref<1x!tpu.dma_semaphore, #tpu.memory_space<semaphore_mem>> -> memref<!tpu.dma_semaphore, #tpu.memory_space<semaphore_mem>>
    tpu.enqueue_dma source(%16 : memref<1x32xf32, #tpu.memory_space<any>>) target(%17 : memref<1x32xf32, #tpu.memory_space<vmem>>) target_semaphore(%19 : memref<!tpu.dma_semaphore, #tpu.memory_space<semaphore_mem>>)
    %c4 = arith.constant 4 : index
    %20 = memref.load %arg0[%c4] : memref<8xi32, #tpu.memory_space<smem>>
    %c4_i32 = arith.constant 4 : i32
    %c0_i32_12 = arith.constant 0 : i32
    %21 = tpu.memref_slice %arg4[%20, %c0_i32_12] : memref<8x32xf32, #tpu.memory_space<any>> -> memref<1x32xf32, #tpu.memory_space<any>>
    %c4_i32_13 = arith.constant 4 : i32
    %c0_i32_14 = arith.constant 0 : i32
    %22 = tpu.memref_slice %arg6[%c4_i32_13, %c0_i32_14] : memref<8x32xf32, #tpu.memory_space<vmem>> -> memref<1x32xf32, #tpu.memory_space<vmem>>
    %23 = tpu.memref_slice %arg7[%c4_i32] : memref<8x!tpu.dma_semaphore, #tpu.memory_space<semaphore_mem>> -> memref<1x!tpu.dma_semaphore, #tpu.memory_space<semaphore_mem>>
    %24 = tpu.memref_squeeze %23 : memref<1x!tpu.dma_semaphore, #tpu.memory_space<semaphore_mem>> -> memref<!tpu.dma_semaphore, #tpu.memory_space<semaphore_mem>>
    tpu.enqueue_dma source(%21 : memref<1x32xf32, #tpu.memory_space<any>>) target(%22 : memref<1x32xf32, #tpu.memory_space<vmem>>) target_semaphore(%24 : memref<!tpu.dma_semaphore, #tpu.memory_space<semaphore_mem>>)
    %c5 = arith.constant 5 : index
    %25 = memref.load %arg0[%c5] : memref<8xi32, #tpu.memory_space<smem>>
    %c5_i32 = arith.constant 5 : i32
    %c0_i32_15 = arith.constant 0 : i32
    %26 = tpu.memref_slice %arg4[%25, %c0_i32_15] : memref<8x32xf32, #tpu.memory_space<any>> -> memref<1x32xf32, #tpu.memory_space<any>>
    %c5_i32_16 = arith.constant 5 : i32
    %c0_i32_17 = arith.constant 0 : i32
    %27 = tpu.memref_slice %arg6[%c5_i32_16, %c0_i32_17] : memref<8x32xf32, #tpu.memory_space<vmem>> -> memref<1x32xf32, #tpu.memory_space<vmem>>
    %28 = tpu.memref_slice %arg7[%c5_i32] : memref<8x!tpu.dma_semaphore, #tpu.memory_space<semaphore_mem>> -> memref<1x!tpu.dma_semaphore, #tpu.memory_space<semaphore_mem>>
    %29 = tpu.memref_squeeze %28 : memref<1x!tpu.dma_semaphore, #tpu.memory_space<semaphore_mem>> -> memref<!tpu.dma_semaphore, #tpu.memory_space<semaphore_mem>>
    tpu.enqueue_dma source(%26 : memref<1x32xf32, #tpu.memory_space<any>>) target(%27 : memref<1x32xf32, #tpu.memory_space<vmem>>) target_semaphore(%29 : memref<!tpu.dma_semaphore, #tpu.memory_space<semaphore_mem>>)
    %c6 = arith.constant 6 : index
    %30 = memref.load %arg0[%c6] : memref<8xi32, #tpu.memory_space<smem>>
    %c6_i32 = arith.constant 6 : i32
    %c0_i32_18 = arith.constant 0 : i32
    %31 = tpu.memref_slice %arg4[%30, %c0_i32_18] : memref<8x32xf32, #tpu.memory_space<any>> -> memref<1x32xf32, #tpu.memory_space<any>>
    %c6_i32_19 = arith.constant 6 : i32
    %c0_i32_20 = arith.constant 0 : i32
    %32 = tpu.memref_slice %arg6[%c6_i32_19, %c0_i32_20] : memref<8x32xf32, #tpu.memory_space<vmem>> -> memref<1x32xf32, #tpu.memory_space<vmem>>
    %33 = tpu.memref_slice %arg7[%c6_i32] : memref<8x!tpu.dma_semaphore, #tpu.memory_space<semaphore_mem>> -> memref<1x!tpu.dma_semaphore, #tpu.memory_space<semaphore_mem>>
    %34 = tpu.memref_squeeze %33 : memref<1x!tpu.dma_semaphore, #tpu.memory_space<semaphore_mem>> -> memref<!tpu.dma_semaphore, #tpu.memory_space<semaphore_mem>>
    tpu.enqueue_dma source(%31 : memref<1x32xf32, #tpu.memory_space<any>>) target(%32 : memref<1x32xf32, #tpu.memory_space<vmem>>) target_semaphore(%34 : memref<!tpu.dma_semaphore, #tpu.memory_space<semaphore_mem>>)
    %c7 = arith.constant 7 : index
    %35 = memref.load %arg0[%c7] : memref<8xi32, #tpu.memory_space<smem>>
    %c7_i32 = arith.constant 7 : i32
    %c0_i32_21 = arith.constant 0 : i32
    %36 = tpu.memref_slice %arg4[%35, %c0_i32_21] : memref<8x32xf32, #tpu.memory_space<any>> -> memref<1x32xf32, #tpu.memory_space<any>>
    %c7_i32_22 = arith.constant 7 : i32
    %c0_i32_23 = arith.constant 0 : i32
    %37 = tpu.memref_slice %arg6[%c7_i32_22, %c0_i32_23] : memref<8x32xf32, #tpu.memory_space<vmem>> -> memref<1x32xf32, #tpu.memory_space<vmem>>
    %38 = tpu.memref_slice %arg7[%c7_i32] : memref<8x!tpu.dma_semaphore, #tpu.memory_space<semaphore_mem>> -> memref<1x!tpu.dma_semaphore, #tpu.memory_space<semaphore_mem>>
    %39 = tpu.memref_squeeze %38 : memref<1x!tpu.dma_semaphore, #tpu.memory_space<semaphore_mem>> -> memref<!tpu.dma_semaphore, #tpu.memory_space<semaphore_mem>>
    tpu.enqueue_dma source(%36 : memref<1x32xf32, #tpu.memory_space<any>>) target(%37 : memref<1x32xf32, #tpu.memory_space<vmem>>) target_semaphore(%39 : memref<!tpu.dma_semaphore, #tpu.memory_space<semaphore_mem>>)
    %c0_i32_24 = arith.constant 0 : i32
    %c0_i32_25 = arith.constant 0 : i32
    %40 = tpu.memref_slice %arg4[%0, %c0_i32_25] : memref<8x32xf32, #tpu.memory_space<any>> -> memref<1x32xf32, #tpu.memory_space<any>>
    %c0_i32_26 = arith.constant 0 : i32
    %c0_i32_27 = arith.constant 0 : i32
    %41 = tpu.memref_slice %arg6[%c0_i32_26, %c0_i32_27] : memref<8x32xf32, #tpu.memory_space<vmem>> -> memref<1x32xf32, #tpu.memory_space<vmem>>
    %42 = tpu.memref_slice %arg7[%c0_i32_24] : memref<8x!tpu.dma_semaphore, #tpu.memory_space<semaphore_mem>> -> memref<1x!tpu.dma_semaphore, #tpu.memory_space<semaphore_mem>>
    %43 = tpu.memref_squeeze %42 : memref<1x!tpu.dma_semaphore, #tpu.memory_space<semaphore_mem>> -> memref<!tpu.dma_semaphore, #tpu.memory_space<semaphore_mem>>
    tpu.wait_dma2 semaphore(%43 : memref<!tpu.dma_semaphore, #tpu.memory_space<semaphore_mem>>) src(%40 : memref<1x32xf32, #tpu.memory_space<any>>) dst(%41 : memref<1x32xf32, #tpu.memory_space<vmem>>)
    %c1_i32_28 = arith.constant 1 : i32
    %c0_i32_29 = arith.constant 0 : i32
    %44 = tpu.memref_slice %arg4[%5, %c0_i32_29] : memref<8x32xf32, #tpu.memory_space<any>> -> memref<1x32xf32, #tpu.memory_space<any>>
    %c1_i32_30 = arith.constant 1 : i32
    %c0_i32_31 = arith.constant 0 : i32
    %45 = tpu.memref_slice %arg6[%c1_i32_30, %c0_i32_31] : memref<8x32xf32, #tpu.memory_space<vmem>> -> memref<1x32xf32, #tpu.memory_space<vmem>>
    %46 = tpu.memref_slice %arg7[%c1_i32_28] : memref<8x!tpu.dma_semaphore, #tpu.memory_space<semaphore_mem>> -> memref<1x!tpu.dma_semaphore, #tpu.memory_space<semaphore_mem>>
    %47 = tpu.memref_squeeze %46 : memref<1x!tpu.dma_semaphore, #tpu.memory_space<semaphore_mem>> -> memref<!tpu.dma_semaphore, #tpu.memory_space<semaphore_mem>>
    tpu.wait_dma2 semaphore(%47 : memref<!tpu.dma_semaphore, #tpu.memory_space<semaphore_mem>>) src(%44 : memref<1x32xf32, #tpu.memory_space<any>>) dst(%45 : memref<1x32xf32, #tpu.memory_space<vmem>>)
    %c2_i32_32 = arith.constant 2 : i32
    %c0_i32_33 = arith.constant 0 : i32
    %48 = tpu.memref_slice %arg4[%10, %c0_i32_33] : memref<8x32xf32, #tpu.memory_space<any>> -> memref<1x32xf32, #tpu.memory_space<any>>
    %c2_i32_34 = arith.constant 2 : i32
    %c0_i32_35 = arith.constant 0 : i32
    %49 = tpu.memref_slice %arg6[%c2_i32_34, %c0_i32_35] : memref<8x32xf32, #tpu.memory_space<vmem>> -> memref<1x32xf32, #tpu.memory_space<vmem>>
    %50 = tpu.memref_slice %arg7[%c2_i32_32] : memref<8x!tpu.dma_semaphore, #tpu.memory_space<semaphore_mem>> -> memref<1x!tpu.dma_semaphore, #tpu.memory_space<semaphore_mem>>
    %51 = tpu.memref_squeeze %50 : memref<1x!tpu.dma_semaphore, #tpu.memory_space<semaphore_mem>> -> memref<!tpu.dma_semaphore, #tpu.memory_space<semaphore_mem>>
    tpu.wait_dma2 semaphore(%51 : memref<!tpu.dma_semaphore, #tpu.memory_space<semaphore_mem>>) src(%48 : memref<1x32xf32, #tpu.memory_space<any>>) dst(%49 : memref<1x32xf32, #tpu.memory_space<vmem>>)
    %c3_i32_36 = arith.constant 3 : i32
    %c0_i32_37 = arith.constant 0 : i32
    %52 = tpu.memref_slice %arg4[%15, %c0_i32_37] : memref<8x32xf32, #tpu.memory_space<any>> -> memref<1x32xf32, #tpu.memory_space<any>>
    %c3_i32_38 = arith.constant 3 : i32
    %c0_i32_39 = arith.constant 0 : i32
    %53 = tpu.memref_slice %arg6[%c3_i32_38, %c0_i32_39] : memref<8x32xf32, #tpu.memory_space<vmem>> -> memref<1x32xf32, #tpu.memory_space<vmem>>
    %54 = tpu.memref_slice %arg7[%c3_i32_36] : memref<8x!tpu.dma_semaphore, #tpu.memory_space<semaphore_mem>> -> memref<1x!tpu.dma_semaphore, #tpu.memory_space<semaphore_mem>>
    %55 = tpu.memref_squeeze %54 : memref<1x!tpu.dma_semaphore, #tpu.memory_space<semaphore_mem>> -> memref<!tpu.dma_semaphore, #tpu.memory_space<semaphore_mem>>
    tpu.wait_dma2 semaphore(%55 : memref<!tpu.dma_semaphore, #tpu.memory_space<semaphore_mem>>) src(%52 : memref<1x32xf32, #tpu.memory_space<any>>) dst(%53 : memref<1x32xf32, #tpu.memory_space<vmem>>)
    %c4_i32_40 = arith.constant 4 : i32
    %c0_i32_41 = arith.constant 0 : i32
    %56 = tpu.memref_slice %arg4[%20, %c0_i32_41] : memref<8x32xf32, #tpu.memory_space<any>> -> memref<1x32xf32, #tpu.memory_space<any>>
    %c4_i32_42 = arith.constant 4 : i32
    %c0_i32_43 = arith.constant 0 : i32
    %57 = tpu.memref_slice %arg6[%c4_i32_42, %c0_i32_43] : memref<8x32xf32, #tpu.memory_space<vmem>> -> memref<1x32xf32, #tpu.memory_space<vmem>>
    %58 = tpu.memref_slice %arg7[%c4_i32_40] : memref<8x!tpu.dma_semaphore, #tpu.memory_space<semaphore_mem>> -> memref<1x!tpu.dma_semaphore, #tpu.memory_space<semaphore_mem>>
    %59 = tpu.memref_squeeze %58 : memref<1x!tpu.dma_semaphore, #tpu.memory_space<semaphore_mem>> -> memref<!tpu.dma_semaphore, #tpu.memory_space<semaphore_mem>>
    tpu.wait_dma2 semaphore(%59 : memref<!tpu.dma_semaphore, #tpu.memory_space<semaphore_mem>>) src(%56 : memref<1x32xf32, #tpu.memory_space<any>>) dst(%57 : memref<1x32xf32, #tpu.memory_space<vmem>>)
    %c5_i32_44 = arith.constant 5 : i32
    %c0_i32_45 = arith.constant 0 : i32
    %60 = tpu.memref_slice %arg4[%25, %c0_i32_45] : memref<8x32xf32, #tpu.memory_space<any>> -> memref<1x32xf32, #tpu.memory_space<any>>
    %c5_i32_46 = arith.constant 5 : i32
    %c0_i32_47 = arith.constant 0 : i32
    %61 = tpu.memref_slice %arg6[%c5_i32_46, %c0_i32_47] : memref<8x32xf32, #tpu.memory_space<vmem>> -> memref<1x32xf32, #tpu.memory_space<vmem>>
    %62 = tpu.memref_slice %arg7[%c5_i32_44] : memref<8x!tpu.dma_semaphore, #tpu.memory_space<semaphore_mem>> -> memref<1x!tpu.dma_semaphore, #tpu.memory_space<semaphore_mem>>
    %63 = tpu.memref_squeeze %62 : memref<1x!tpu.dma_semaphore, #tpu.memory_space<semaphore_mem>> -> memref<!tpu.dma_semaphore, #tpu.memory_space<semaphore_mem>>
    tpu.wait_dma2 semaphore(%63 : memref<!tpu.dma_semaphore, #tpu.memory_space<semaphore_mem>>) src(%60 : memref<1x32xf32, #tpu.memory_space<any>>) dst(%61 : memref<1x32xf32, #tpu.memory_space<vmem>>)
    %c6_i32_48 = arith.constant 6 : i32
    %c0_i32_49 = arith.constant 0 : i32
    %64 = tpu.memref_slice %arg4[%30, %c0_i32_49] : memref<8x32xf32, #tpu.memory_space<any>> -> memref<1x32xf32, #tpu.memory_space<any>>
    %c6_i32_50 = arith.constant 6 : i32
    %c0_i32_51 = arith.constant 0 : i32
    %65 = tpu.memref_slice %arg6[%c6_i32_50, %c0_i32_51] : memref<8x32xf32, #tpu.memory_space<vmem>> -> memref<1x32xf32, #tpu.memory_space<vmem>>
    %66 = tpu.memref_slice %arg7[%c6_i32_48] : memref<8x!tpu.dma_semaphore, #tpu.memory_space<semaphore_mem>> -> memref<1x!tpu.dma_semaphore, #tpu.memory_space<semaphore_mem>>
    %67 = tpu.memref_squeeze %66 : memref<1x!tpu.dma_semaphore, #tpu.memory_space<semaphore_mem>> -> memref<!tpu.dma_semaphore, #tpu.memory_space<semaphore_mem>>
    tpu.wait_dma2 semaphore(%67 : memref<!tpu.dma_semaphore, #tpu.memory_space<semaphore_mem>>) src(%64 : memref<1x32xf32, #tpu.memory_space<any>>) dst(%65 : memref<1x32xf32, #tpu.memory_space<vmem>>)
    %c7_i32_52 = arith.constant 7 : i32
    %c0_i32_53 = arith.constant 0 : i32
    %68 = tpu.memref_slice %arg4[%35, %c0_i32_53] : memref<8x32xf32, #tpu.memory_space<any>> -> memref<1x32xf32, #tpu.memory_space<any>>
    %c7_i32_54 = arith.constant 7 : i32
    %c0_i32_55 = arith.constant 0 : i32
    %69 = tpu.memref_slice %arg6[%c7_i32_54, %c0_i32_55] : memref<8x32xf32, #tpu.memory_space<vmem>> -> memref<1x32xf32, #tpu.memory_space<vmem>>
    %70 = tpu.memref_slice %arg7[%c7_i32_52] : memref<8x!tpu.dma_semaphore, #tpu.memory_space<semaphore_mem>> -> memref<1x!tpu.dma_semaphore, #tpu.memory_space<semaphore_mem>>
    %71 = tpu.memref_squeeze %70 : memref<1x!tpu.dma_semaphore, #tpu.memory_space<semaphore_mem>> -> memref<!tpu.dma_semaphore, #tpu.memory_space<semaphore_mem>>
    tpu.wait_dma2 semaphore(%71 : memref<!tpu.dma_semaphore, #tpu.memory_space<semaphore_mem>>) src(%68 : memref<1x32xf32, #tpu.memory_space<any>>) dst(%69 : memref<1x32xf32, #tpu.memory_space<vmem>>)
    %c0_56 = arith.constant 0 : index
    %c0_57 = arith.constant 0 : index
    %72 = vector.load %arg2[%c0_56, %c0_57] : memref<8x32xf32, #tpu.memory_space<vmem>>, vector<8x32xf32>
    %c0_58 = arith.constant 0 : index
    %c0_59 = arith.constant 0 : index
    %73 = vector.load %arg3[%c0_58, %c0_59] : memref<8x32xf32, #tpu.memory_space<vmem>>, vector<8x32xf32>
    %c0_60 = arith.constant 0 : index
    %c0_61 = arith.constant 0 : index
    %74 = vector.load %arg6[%c0_60, %c0_61] : memref<8x32xf32, #tpu.memory_space<vmem>>, vector<8x32xf32>
    %c0_62 = arith.constant 0 : index
    %c0_63 = arith.constant 0 : index
    %75 = vector.load %arg1[%c0_62, %c0_63] : memref<8x1xi32, #tpu.memory_space<vmem>>, vector<8x1xi32>
    %c0_i32_64 = arith.constant 0 : i32
    %76 = vector.broadcast %c0_i32_64 : i32 to vector<8x1xi32>
    %77 = arith.cmpi ne, %75, %76 : vector<8x1xi32>
    %78 = arith.subf %72, %74 : vector<8x32xf32>
    %cst = arith.constant 9.99999997E-7 : f32
    %79 = vector.broadcast %cst : f32 to vector<8x32xf32>
    %80 = arith.addf %78, %79 : vector<8x32xf32>
    %cst_65 = arith.constant 9.99999997E-7 : f32
    %81 = vector.shape_cast %77 : vector<8x1xi1> to vector<8x1xi1>
    %82 = vector.broadcast %81 : vector<8x1xi1> to vector<8x32xi1>
    %83 = vector.broadcast %cst_65 : f32 to vector<8x32xf32>
    %84 = arith.select %82, %83, %80 : vector<8x32xi1>, vector<8x32xf32>
    %85 = arith.subf %72, %73 : vector<8x32xf32>
    %cst_66 = arith.constant 9.99999997E-7 : f32
    %86 = vector.broadcast %cst_66 : f32 to vector<8x32xf32>
    %87 = arith.addf %85, %86 : vector<8x32xf32>
    %88 = arith.mulf %87, %87 : vector<8x32xf32>
    %cst_67 = arith.constant dense<0.000000e+00> : vector<8xf32>
    %89 = vector.multi_reduction <add>, %88, %cst_67 [1] : vector<8x32xf32> to vector<8xf32>
    %90 = vector.shape_cast %89 : vector<8xf32> to vector<8x1xf32>
    %91 = math.sqrt %90 : vector<8x1xf32>
    %92 = arith.mulf %84, %84 : vector<8x32xf32>
    %cst_68 = arith.constant dense<0.000000e+00> : vector<8xf32>
    %93 = vector.multi_reduction <add>, %92, %cst_68 [1] : vector<8x32xf32> to vector<8xf32>
    %94 = vector.shape_cast %93 : vector<8xf32> to vector<8x1xf32>
    %95 = math.sqrt %94 : vector<8x1xf32>
    %96 = arith.subf %91, %95 : vector<8x1xf32>
    %cst_69 = arith.constant 1.000000e+01 : f32
    %97 = vector.broadcast %cst_69 : f32 to vector<8x1xf32>
    %98 = arith.addf %96, %97 : vector<8x1xf32>
    %cst_70 = arith.constant 0.000000e+00 : f32
    %99 = vector.broadcast %cst_70 : f32 to vector<8x1xf32>
    %100 = arith.maximumf %98, %99 : vector<8x1xf32>
    %101 = vector.shape_cast %100 : vector<8x1xf32> to vector<1x8x1xf32>
    %cst_71 = arith.constant dense<0.000000e+00> : vector<1xf32>
    %102 = vector.multi_reduction <add>, %101, %cst_71 [1, 2] : vector<1x8x1xf32> to vector<1xf32>
    %103 = vector.shape_cast %102 : vector<1xf32> to vector<1x1x1xf32>
    %104 = vector.extract %103[0, 0, 0] : f32 from vector<1x1x1xf32>
    %cst_72 = arith.constant 8.000000e+00 : f32
    %105 = arith.divf %104, %cst_72 : f32
    %c0_73 = arith.constant 0 : index
    %106 = memref.load %arg5[%c0_73] : memref<1xf32, #tpu.memory_space<smem>>
    memref.store %105, %arg5[%c0_73] : memref<1xf32, #tpu.memory_space<smem>>
    return
  }
}

</mosaic_0001>

<bundles_post_ra>
// kernel: tpu_custom_call.1
= control target key start
LH: loop header
LB: loop body
LE: loop exit
PB: predicated region body
PF: predicated region fallthrough
CT: control target
= control target key end

     0   :  { %10 = vsyncpa [#allocation5], 0  ;;  %s805_s0 = inlined_call_operand.hbm [shape: s32[8], index: 0, kind: input, shape index: {}]   ;;  %s806_s1 = inlined_call_operand.vmem [shape: s32[8,1], index: 1, kind: input, shape index: {}]   ;;  %s807_s2 = inlined_call_operand.vmem [shape: f32[8,32], index: 2, kind: input, shape index: {}]   ;;  %s808_s3 = inlined_call_operand.vmem [shape: f32[8,32], index: 3, kind: input, shape index: {}]   ;;  %s809_s4 = inlined_call_operand.vmem [shape: f32[8,32], index: 4, kind: input, shape index: {}]   ;;  %s810_s5 = inlined_call_operand.hbm [shape: f32[1], index: 5, kind: output, shape index: {}]  }
   0x1   :  { %11 = vsyncpa [#allocation6], 0  ;;  %s675_s20 = scalar_lea.hbm %s805_s0, 16 }
   0x2   :  { %p676_p0 = scmp.ne.s32.totalorder %s805_s0, %s675_s20  ;;  %p679_p1 = scmp.lt.u32.totalorder %s675_s20, %s805_s0 }
   0x4   :  { %p681_p2 = pnand %p679_p1, %p676_p0 }
   0x6   :  { %684 = shalt.err (!%p681_p2)
}
   0x7   :  { %s715_s25 = smov [#allocation4]  }
   0x8   :  { %19 = dma.hbm_to_smem %s805_s0, 16, %s715_s25, [#allocation5]  }
   0x9   :  { %695 = dma.done.wait [#allocation5], 16  }
   0xa   :  { %696 = vsyncadd [#allocation5], 4294967280 }
   0xb   :  { %29 = sfence }
   0xc   :  { %s30_s28 = sld [smem:[#allocation4]] }
  0x12   :  { %s31_s6 = scalar_lea.vmem %s809_s4, %s30_s28 }
  0x13   :  { %v49_v0 = vld [vmem:[%s31_s6] sm:$0x1] }
  0x14   :  { %50 = vst [vmem:[#allocation2] sm:$0x1] %v49_v0 }
  0x15   :  { %75 = vsyncadd [#allocation3], 16  ;;  %s650_s7 = sld [smem:[#allocation4 + $0x1]] }
  0x1b   :  { %s77_s10 = scalar_lea.vmem %s809_s4, %s650_s7 }
  0x1c   :  { %v97_v1 = vld [vmem:[%s77_s10] sm:$0x1] }
  0x1d   :  { %98 = vst [vmem:[#allocation2 + $0x1] sm:$0x1] %v97_v1 }
  0x1e   :  { %123 = vsyncadd [#allocation3 + $0x1], 16  ;;  %s651_s0 = sld [smem:[#allocation4 + $0x2]] }
  0x24   :  { %s125_s13 = scalar_lea.vmem %s809_s4, %s651_s0 }
  0x25   :  { %v145_v2 = vld [vmem:[%s125_s13] sm:$0x1] }
  0x26   :  { %146 = vst [vmem:[#allocation2 + $0x2] sm:$0x1] %v145_v2 }
  0x27   :  { %171 = vsyncadd [#allocation3 + $0x2], 16  ;;  %s652_s14 = sld [smem:[#allocation4 + $0x3]] }
  0x2d   :  { %s173_s17 = scalar_lea.vmem %s809_s4, %s652_s14 }
  0x2e   :  { %v193_v3 = vld [vmem:[%s173_s17] sm:$0x1] }
  0x2f   :  { %194 = vst [vmem:[#allocation2 + $0x3] sm:$0x1] %v193_v3 }
  0x30   :  { %219 = vsyncadd [#allocation3 + $0x3], 16  ;;  %s653_s18 = sld [smem:[#allocation4 + $0x4]] }
  0x36   :  { %s221_s21 = scalar_lea.vmem %s809_s4, %s653_s18 }
  0x37   :  { %v241_v4 = vld [vmem:[%s221_s21] sm:$0x1] }
  0x38   :  { %242 = vst [vmem:[#allocation2 + $0x4] sm:$0x1] %v241_v4 }
  0x39   :  { %267 = vsyncadd [#allocation3 + $0x4], 16  ;;  %s654_s22 = sld [smem:[#allocation4 + $0x5]] }
  0x3f   :  { %s269_s25 = scalar_lea.vmem %s809_s4, %s654_s22 }
  0x40   :  { %v289_v5 = vld [vmem:[%s269_s25] sm:$0x1] }
  0x41   :  { %290 = vst [vmem:[#allocation2 + $0x5] sm:$0x1] %v289_v5 }
  0x42   :  { %315 = vsyncadd [#allocation3 + $0x5], 16  ;;  %s655_s26 = sld [smem:[#allocation4 + $0x6]] }
  0x48   :  { %s317_s29 = scalar_lea.vmem %s809_s4, %s655_s26 }
  0x49   :  { %v337_v6 = vld [vmem:[%s317_s29] sm:$0x1] }
  0x4a   :  { %338 = vst [vmem:[#allocation2 + $0x6] sm:$0x1] %v337_v6 }
  0x4b   :  { %363 = vsyncadd [#allocation3 + $0x6], 16  ;;  %s656_s30 = sld [smem:[#allocation4 + $0x7]] }
  0x51   :  { %s365_s8 = scalar_lea.vmem %s809_s4, %s656_s30 }
  0x52   :  { %v385_v7 = vld [vmem:[%s365_s8] sm:$0x1] }
  0x53   :  { %386 = vst [vmem:[#allocation2 + $0x7] sm:$0x1] %v385_v7 }
  0x54   :  { %411 = vsyncadd [#allocation3 + $0x7], 16 }
  0x55   :  { %697 = dma.done.wait [#allocation3], 16 }
  0x56   :  { %698 = vsyncadd [#allocation3], 4294967280 }
  0x57   :  { %699 = dma.done.wait [#allocation3 + $0x1], 16 }
  0x58   :  { %700 = vsyncadd [#allocation3 + $0x1], 4294967280 }
  0x59   :  { %701 = dma.done.wait [#allocation3 + $0x2], 16 }
  0x5a   :  { %702 = vsyncadd [#allocation3 + $0x2], 4294967280 }
  0x5b   :  { %703 = dma.done.wait [#allocation3 + $0x3], 16 }
  0x5c   :  { %704 = vsyncadd [#allocation3 + $0x3], 4294967280 }
  0x5d   :  { %705 = dma.done.wait [#allocation3 + $0x4], 16 }
  0x5e   :  { %706 = vsyncadd [#allocation3 + $0x4], 4294967280 }
  0x5f   :  { %707 = dma.done.wait [#allocation3 + $0x5], 16 }
  0x60   :  { %708 = vsyncadd [#allocation3 + $0x5], 4294967280 }
  0x61   :  { %709 = dma.done.wait [#allocation3 + $0x6], 16 }
  0x62   :  { %710 = vsyncadd [#allocation3 + $0x6], 4294967280 }
  0x63   :  { %711 = dma.done.wait [#allocation3 + $0x7], 16 }
  0x64   :  { %712 = vsyncadd [#allocation3 + $0x7], 4294967280  ;;  %v716_v8 = vmov 0   ;;  %v432_v9 = vld [vmem:[%s806_s1] sm:$0xff]  ;;  %vm445_vm1 = vcmask 261120   ;;  %vm470_vm7 = vcmask 7168  }
  0x65   :  { %670 = vset.pattern.permute.xlu0 %v716_v8  ;;  %vm433_vm0 = vcmp.ne.s32.totalorder %v432_v9, 0  ;;  %v429_v11 = vld [vmem:[%s807_s2] sm:$0xff]  ;;  %s685_s14 = scalar_lea.hbm %s810_s5, 16 }
  0x66   :  { %v436_v10 = vsel %vm433_vm0, 1, %v716_v8  ;;  %v430_v12 = vld [vmem:[%s808_s3] sm:$0xff]  ;;  %p686_p3 = scmp.ne.s32.totalorder %s810_s5, %s685_s14  ;;  %p689_p4 = scmp.lt.u32.totalorder %s685_s14, %s810_s5 }
  0x67   :  { %438 = vperm.xlu0 %670, %v436_v10   ;;  %v442_v13 = vsub.f32 %v429_v11, %v430_v12  ;;  %v431_v17 = vld [vmem:[#allocation2] sm:$0xff] }
  0x68   :  { %v434_v18 = vsub.f32 %v429_v11, %v431_v17  ;;  %p691_p5 = pnand %p689_p4, %p686_p3 }
  0x69   :  { %v443_v14 = vadd.f32 1e-06, %v442_v13 }
  0x6a   :  { %v435_v19 = vadd.f32 1e-06, %v434_v18 }
  0x6b   :  { %v444_v15 = vmul.f32 %v443_v14, %v443_v14 }
  0x6d   :  { %v446_v16 = vsel %vm445_vm1, %v444_v15, 0.0 }
  0x86   :  { %447 = vadd.xlane.f32.xlu0 %v446_v16 }
  0xe6   :  { %v439_v20 = vpop.permute.xlu0 %438 }
  0xe7   :  { %vm440_vm2 = vcmp.eq.s32.totalorder %v439_v20, 1 }
  0xe8   :  { %v441_v21 = vsel %vm440_vm2, 1e-06, %v435_v19 }
  0xe9   :  { %v456_v22 = vmul.f32 %v441_v21, %v441_v21 }
  0xeb   :  { %v457_v23 = vsel %vm445_vm1, %v456_v22, 0.0 }
  0xec   :  { %458 = vadd.xlane.f32.xlu1 %v457_v23 }
 0x113   :  { %v448_v24 = vpop.xlane.xlu0 %447 }
 0x114   :  { %671 = vrsqrt.f32 %v448_v24  ;;  %vm451_vm3 = vcmp.eq.f32.partialorder %v448_v24, inf  ;;  %v454_v29 = vand.u32 2147483648, %v448_v24  ;;  %vm453_vm4 = vcmp.eq.f32.partialorder %v448_v24, 0.0 }
 0x11e   :  { %v672_v26 = vpop.eup %671 }
 0x11f   :  { %v450_v27 = vmul.f32 %v672_v26, %v448_v24 }
 0x121   :  { %v452_v30 = vsel %vm451_vm3, %v448_v24, %v450_v27 }
 0x122   :  { %v455_v34 = vsel %vm453_vm4, %v454_v29, %v452_v30 }
 0x179   :  { %v459_v25 = vpop.xlane.xlu1 %458 }
 0x17a   :  { %673 = vrsqrt.f32 %v459_v25  ;;  %vm462_vm5 = vcmp.eq.f32.partialorder %v459_v25, inf  ;;  %v465_v32 = vand.u32 2147483648, %v459_v25  ;;  %vm464_vm6 = vcmp.eq.f32.partialorder %v459_v25, 0.0 }
 0x184   :  { %v674_v28 = vpop.eup %673 }
 0x185   :  { %v461_v31 = vmul.f32 %v674_v28, %v459_v25 }
 0x187   :  { %v463_v33 = vsel %vm462_vm5, %v459_v25, %v461_v31 }
 0x188   :  { %v466_v35 = vsel %vm464_vm6, %v465_v32, %v463_v33 }
 0x189   :  { %v467_v36 = vsub.f32 %v455_v34, %v466_v35 }
 0x18b   :  { %v468_v37 = vadd.f32 10.0, %v467_v36 }
 0x18d   :  { %v469_v38 = vmax.f32 %v468_v37, 0.0 }
 0x18f   :  { %v471_v39 = vsel %vm470_vm7, %v469_v38, 0.0 }
 0x190   :  { %472 = vadd.xlane.f32.xlu1 %v471_v39 }
 0x21d   :  { %v473_v40 = vpop.xlane.xlu1 %472 }
 0x21e   :  { %v474_v41 = vrot.slane %v473_v40, 4 }
 0x220   :  { %v475_v42 = vadd.f32 %v474_v41, %v473_v40 }
 0x222   :  { %v476_v43 = vrot.slane %v475_v42, 2 }
 0x224   :  { %v477_v44 = vadd.f32 %v476_v43, %v475_v42 }
 0x226   :  { %v478_v45 = vrot.slane %v477_v44, 1 }
 0x228   :  { %v479_v46 = vadd.f32 %v478_v45, %v477_v44 }
 0x22a   :  { %665 = vpush %v479_v46 }
 0x25b   :  { %s666_s1 = spop %665 }
 0x25c   :  { %s483_s2 = smul.f32 0.125, %s666_s1 }
 0x25e   :  { %485 = sst [smem:[#allocation7]] %s483_s2 }
 0x25f   :  { %694 = shalt.err (!%p691_p5)
}
 0x260   :  { %s717_s19 = smov [#allocation7]  }
 0x261   :  { %493 = dma.smem_to_hbm %s717_s19, 16, %s810_s5, [#allocation6]  }
 0x262   :  { %713 = dma.done.wait [#allocation6], 16  }
 0x263   :  { %714 = vsyncadd [#allocation6], 4294967280 }
 0x264   :  { %497 = sfence }
 0x265   :  { %498 = vsyncpa [#allocation5], 1 }
 0x266   :  { %499 = vsyncpa [#allocation6], 1 }
 0x267   :  { %500 = vsyncmov [#allocation3] }
 0x26a   :  { %s501_s22 = vpop.sfrf %500 }
 0x26b   :  { %p657_p6 = scmp.ne.s32.totalorder %s501_s22, 0 }
 0x26d   :  { %505 = shalt.err (%p657_p6)  }
 0x26e   :  { %507 = vsyncmov [#allocation3 + $0x1] }
 0x271   :  { %s508_s23 = vpop.sfrf %507 }
 0x272   :  { %p658_p7 = scmp.ne.s32.totalorder %s508_s23, 0 }
 0x274   :  { %512 = shalt.err (%p658_p7)  }
 0x275   :  { %514 = vsyncmov [#allocation3 + $0x2] }
 0x278   :  { %s515_s24 = vpop.sfrf %514 }
 0x279   :  { %p659_p8 = scmp.ne.s32.totalorder %s515_s24, 0 }
 0x27b   :  { %519 = shalt.err (%p659_p8)  }
 0x27c   :  { %521 = vsyncmov [#allocation3 + $0x3] }
 0x27f   :  { %s522_s25 = vpop.sfrf %521 }
 0x280   :  { %p660_p9 = scmp.ne.s32.totalorder %s522_s25, 0 }
 0x282   :  { %526 = shalt.err (%p660_p9)  }
 0x283   :  { %528 = vsyncmov [#allocation3 + $0x4] }
 0x286   :  { %s529_s5 = vpop.sfrf %528 }
 0x287   :  { %p661_p10 = scmp.ne.s32.totalorder %s529_s5, 0 }
 0x289   :  { %533 = shalt.err (%p661_p10)  }
 0x28a   :  { %535 = vsyncmov [#allocation3 + $0x5] }
 0x28d   :  { %s536_s26 = vpop.sfrf %535 }
 0x28e   :  { %p662_p11 = scmp.ne.s32.totalorder %s536_s26, 0 }
 0x290   :  { %540 = shalt.err (%p662_p11)  }
 0x291   :  { %542 = vsyncmov [#allocation3 + $0x6] }
 0x294   :  { %s543_s27 = vpop.sfrf %542 }
 0x295   :  { %p663_p12 = scmp.ne.s32.totalorder %s543_s27, 0 }
 0x297   :  { %547 = shalt.err (%p663_p12)  }
 0x298   :  { %549 = vsyncmov [#allocation3 + $0x7] }
 0x29b   :  { %s550_s28 = vpop.sfrf %549 }
 0x29c   :  { %p664_p13 = scmp.ne.s32.totalorder %s550_s28, 0 }
 0x29e   :  { %554 = shalt.err (%p664_p13)  }

</bundles_post_ra>
